<compile_context>
chip_gen: v7x
topology: tpu7x:2x2x1
jax: 0.10.0
libtpu: 0.0.40
codegen_flags: <defaults>
</compile_context>

<pallas_src>
import functools

import jax
import jax.numpy as jnp
from jax.experimental import pallas as pl
from jax.experimental.pallas import tpu as pltpu


def _round_up(x, m):
    return ((x + m - 1) // m) * m


# --------------------------- kernel 1: projections ---------------------------
def _proj_kernel(nodes_ref, w_ref, w12_ref, h_ref, f12_ref):
    # h = nodes @ W_pad                                   -> [tn, hcp]
    h = jnp.dot(nodes_ref[...], w_ref[...], preferred_element_type=jnp.float32)
    h_ref[...] = h
    # f12 = h @ [w1 | w2 | 0...]  (merged, lane-dense)    -> [tn, 128]
    f12_ref[...] = jnp.dot(h, w12_ref[...], preferred_element_type=jnp.float32)


# --------- kernel 2: online-softmax attention + aggregation (rows x cols) ----
def _attn_kernel(f1_ref, f2_ref, adj_ref, h_ref, b_ref, out_ref,
                 m_sc, l_sc, acc_sc, *, negative_slope, block_cols):
    k = pl.program_id(1)

    @pl.when(k == 0)
    def _():
        m_sc[...] = jnp.full_like(m_sc, -jnp.inf)
        l_sc[...] = jnp.zeros_like(l_sc)
        acc_sc[...] = jnp.zeros_like(acc_sc)

    # logits block = f1 (this row block) + f2 (this column block)   [tn, tk]
    logits = f1_ref[...] + f2_ref[...]
    x = jnp.where(logits > 0, logits, negative_slope * logits)
    # int8 "no-edge" mask -> exact additive -1e9 bias (same math as reference)
    s = x + adj_ref[...].astype(jnp.float32) * (-1e9)

    # online softmax running stats
    m_prev = m_sc[...]
    m_new = jnp.maximum(m_prev, jnp.max(s, axis=-1, keepdims=True))
    alpha = jnp.exp(m_prev - m_new)
    e = jnp.exp(s - m_new)                                # unnormalized coefs
    l_sc[...] = alpha * l_sc[...] + jnp.sum(e, axis=-1, keepdims=True)

    # aggregate against the k-th column block of the resident h
    hk = h_ref[pl.ds(pl.multiple_of(k * block_cols, block_cols), block_cols), :]
    acc_sc[...] = alpha * acc_sc[...] + jnp.dot(
        e, hk, preferred_element_type=jnp.float32)
    m_sc[...] = m_new

    @pl.when(k == pl.num_programs(1) - 1)
    def _():
        # normalize AFTER the aggregation matmul (1/denom is a per-row scalar)
        out_ref[...] = (acc_sc[...] * pl.reciprocal(l_sc[...], approx=False)
                        + b_ref[...]).astype(out_ref.dtype)


# --------------------------------- wrapper -----------------------------------
def gat_conv_forward(nodes, adj_bias_mat, weight, conv_w1, conv_w2, bias,
                     negative_slope=0.2, block_rows=128, block_cols=128):
    n, in_ch = nodes.shape
    hc = weight.shape[1]
    f32 = jnp.float32

    hcp = _round_up(hc, 128)                       # lane-dense feature dim
    tn, tk = block_rows, block_cols
    npad = _round_up(_round_up(n, tn), tk)         # rows/cols tile exactly

    # ---- padded operands ----
    nodes_p = jnp.zeros((npad, in_ch), f32).at[:n, :].set(nodes.astype(f32))
    w_p = jnp.zeros((in_ch, hcp), f32).at[:, :hc].set(weight.astype(f32))
    # lane-dense [hcp, 128]: col 0 = w1, col 1 = w2, rest zeros
    w12_p = jnp.zeros((hcp, 128), f32)
    w12_p = w12_p.at[:hc, 0].set(conv_w1.reshape(hc).astype(f32))
    w12_p = w12_p.at[:hc, 1].set(conv_w2.reshape(hc).astype(f32))
    b_p = jnp.zeros((1, hcp), f32).at[:, :hc].set(bias.reshape(1, hc).astype(f32))

    # int8 "no-edge" mask: 1 = masked (no edge), 0 = edge; padding is masked.
    nonedge = (adj_bias_mat < -0.5).astype(jnp.int8)
    adj_p = jnp.ones((npad, npad), jnp.int8).at[:n, :n].set(nonedge)

    vmem = functools.partial(pl.BlockSpec, memory_space=pltpu.VMEM)
    vmem_limit = 32 * 1024 * 1024   # explicit scoped-VMEM budget (fits v7x/v5e)

    # ---- call 1: projections (tiny, gridded over row blocks) ----
    h, f12 = pl.pallas_call(
        _proj_kernel,
        grid=(npad // tn,),
        in_specs=[
            vmem((tn, in_ch), lambda i: (i, 0)),
            vmem((in_ch, hcp), lambda i: (0, 0)),
            vmem((hcp, 128), lambda i: (0, 0)),
        ],
        out_specs=(
            vmem((tn, hcp), lambda i: (i, 0)),
            vmem((tn, 128), lambda i: (i, 0)),      # lane-dense f12 slab
        ),
        out_shape=(
            jax.ShapeDtypeStruct((npad, hcp), f32),
            jax.ShapeDtypeStruct((npad, 128), f32),
        ),
        compiler_params=pltpu.CompilerParams(
            dimension_semantics=("parallel",),
            vmem_limit_bytes=vmem_limit),
    )(nodes_p, w_p, w12_p)

    # tiny O(N) layout plumbing outside the kernels (f1 column, f2 lane row)
    f1_col = f12[:, 0:1]
    f2_row = f12[:, 1].reshape(1, npad)

    # ---- call 2: online-softmax attention + aggregation ----
    kern = functools.partial(_attn_kernel, negative_slope=negative_slope,
                             block_cols=tk)
    out = pl.pallas_call(
        kern,
        grid=(npad // tn, npad // tk),
        in_specs=[
            vmem((tn, 1), lambda i, k: (i, 0)),     # f1 rows of this block
            vmem((1, tk), lambda i, k: (0, k)),     # f2 slice of this col block
            vmem((tn, tk), lambda i, k: (i, k)),    # adj mask panel, int8 stream
            vmem((npad, hcp), lambda i, k: (0, 0)), # full h, resident (1 DMA)
            vmem((1, hcp), lambda i, k: (0, 0)),    # bias
        ],
        out_specs=vmem((tn, hcp), lambda i, k: (i, 0)),
        out_shape=jax.ShapeDtypeStruct((npad, hcp), f32),
        scratch_shapes=[
            pltpu.VMEM((tn, 1), f32),               # running max
            pltpu.VMEM((tn, 1), f32),               # running denom
            pltpu.VMEM((tn, hcp), f32),             # output accumulator
        ],
        compiler_params=pltpu.CompilerParams(
            dimension_semantics=("parallel", "arbitrary"),
            vmem_limit_bytes=vmem_limit),
    )(f1_col, f2_row, adj_p, h, b_p)

    return out[:n, :hc]


# ------------------------------- test helpers --------------------------------
def _xavier_normal(key, shape):
    fan_in, fan_out = shape[0], shape[1]
    std = (2.0 / (fan_in + fan_out)) ** 0.5
    return std * jax.random.normal(key, shape, dtype=jnp.float32)


def _reference(nodes, adj, w, w1, w2, b, neg_slope=0.2):
    hi = jax.lax.Precision.HIGHEST
    h = jnp.dot(nodes, w, precision=hi)
    logits = jnp.dot(h, w1, precision=hi) + jnp.dot(h, w2, precision=hi).T
    a = jnp.where(logits > 0, logits, neg_slope * logits) + adj
    coefs = jax.nn.softmax(a, axis=-1)
    return jnp.dot(coefs, h, precision=hi) + b


if __name__ == "__main__":
    # Module config: in_channels=32, out_channels=16, heads=2, concat=True
    N, IN_CH, HEADS, OUT_CH = 256, 32, 2, 16     # N=256 -> 2x2 attention grid
    HC = HEADS * OUT_CH

    key = jax.random.PRNGKey(0)
    k_nodes, k_adj, k_w, k_w1, k_w2 = jax.random.split(key, 5)

    nodes = jax.random.normal(k_nodes, (N, IN_CH), dtype=jnp.float32)
    # adjacency bias: 0 for "edge", -1e9 for "no edge"; include self-loops
    adj_mask = (jax.random.uniform(k_adj, (N, N)) < 0.3).astype(jnp.float32)
    adj_mask = jnp.maximum(adj_mask, jnp.eye(N, dtype=jnp.float32))
    adj_bias_mat = (1.0 - adj_mask) * (-1e9)

    weight = _xavier_normal(k_w, (IN_CH, HC))
    conv_w1 = _xavier_normal(k_w1, (HC, 1))
    conv_w2 = _xavier_normal(k_w2, (HC, 1))
    bias = jnp.zeros((1, HC), dtype=jnp.float32)

    out = gat_conv_forward(nodes, adj_bias_mat, weight, conv_w1, conv_w2, bias)
    out = jax.block_until_ready(out)

    ref = _reference(nodes, adj_bias_mat, weight, conv_w1, conv_w2, bias)
    assert out.shape == (N, HC)
    assert jnp.allclose(out, ref, atol=1e-4, rtol=1e-4), "mismatch vs reference"

    print("KERNEL_OK")
</pallas_src>

<mosaic_0001>
module attributes {stable_mosaic.version = 11 : i64} {
  func.func @_proj_kernel(%arg0: i32, %arg1: memref<128x32xf32, #tpu.memory_space<vmem>>, %arg2: memref<32x128xf32, #tpu.memory_space<vmem>>, %arg3: memref<128x128xf32, #tpu.memory_space<vmem>>, %arg4: memref<128x128xf32, #tpu.memory_space<vmem>>, %arg5: memref<128x128xf32, #tpu.memory_space<vmem>>) attributes {dimension_semantics = [#tpu.dimension_semantics<parallel>], iteration_bounds = array<i64: 2>, scalar_prefetch = 0 : i64, scratch_operands = 0 : i64, tpu.core_type = #tpu.core_type<tc>, window_params = [{transform_indices = @transform_0, window_bounds = array<i64: 128, 32>}, {pipeline_mode = #tpu.pipeline_mode<synchronous>, transform_indices = @transform_1, window_bounds = array<i64: 32, 128>}, {pipeline_mode = #tpu.pipeline_mode<synchronous>, transform_indices = @transform_2, window_bounds = array<i64: 128, 128>}, {transform_indices = @transform_3, window_bounds = array<i64: 128, 128>}, {transform_indices = @transform_4, window_bounds = array<i64: 128, 128>}]} {
    %c0 = arith.constant 0 : index
    %c0_0 = arith.constant 0 : index
    %0 = vector.load %arg1[%c0, %c0_0] : memref<128x32xf32, #tpu.memory_space<vmem>>, vector<128x32xf32>
    %c0_1 = arith.constant 0 : index
    %c0_2 = arith.constant 0 : index
    %1 = vector.load %arg2[%c0_1, %c0_2] : memref<32x128xf32, #tpu.memory_space<vmem>>, vector<32x128xf32>
    %cst = arith.constant dense<0.000000e+00> : vector<128x128xf32>
    %2 = tpu.matmul %0, %1, %cst {dimension_numbers = #tpu.dot_dimension_numbers<[1], [0], [0], [1], [0, 0, 1, 1], [], []>} : vector<128x32xf32>, vector<32x128xf32>, vector<128x128xf32> -> vector<128x128xf32>
    %c0_3 = arith.constant 0 : index
    %c0_4 = arith.constant 0 : index
    %3 = vector.load %arg4[%c0_3, %c0_4] : memref<128x128xf32, #tpu.memory_space<vmem>>, vector<128x128xf32>
    tpu.vector_store %arg4[%c0_3, %c0_4], %2 {strides = array<i32>} : memref<128x128xf32, #tpu.memory_space<vmem>>, vector<128x128xf32>,
    %c0_5 = arith.constant 0 : index
    %c0_6 = arith.constant 0 : index
    %4 = vector.load %arg3[%c0_5, %c0_6] : memref<128x128xf32, #tpu.memory_space<vmem>>, vector<128x128xf32>
    %cst_7 = arith.constant dense<0.000000e+00> : vector<128x128xf32>
    %5 = tpu.matmul %2, %4, %cst_7 {dimension_numbers = #tpu.dot_dimension_numbers<[1], [0], [0], [1], [0, 0, 1, 1], [], []>} : vector<128x128xf32>, vector<128x128xf32>, vector<128x128xf32> -> vector<128x128xf32>
    %c0_8 = arith.constant 0 : index
    %c0_9 = arith.constant 0 : index
    %6 = vector.load %arg5[%c0_8, %c0_9] : memref<128x128xf32, #tpu.memory_space<vmem>>, vector<128x128xf32>
    tpu.vector_store %arg5[%c0_8, %c0_9], %5 {strides = array<i32>} : memref<128x128xf32, #tpu.memory_space<vmem>>, vector<128x128xf32>,
    return
  }
  func.func @transform_0(%arg0: i32) -> (i32, i32) {
    %c0_i32 = arith.constant 0 : i32
    %c0_i32_0 = arith.constant 0 : i32
    return %arg0, %c0_i32 : i32, i32
  }
  func.func @transform_1(%arg0: i32) -> (i32, i32) {
    %c0_i32 = arith.constant 0 : i32
    %c0_i32_0 = arith.constant 0 : i32
    %c0_i32_1 = arith.constant 0 : i32
    return %c0_i32, %c0_i32_0 : i32, i32
  }
  func.func @transform_2(%arg0: i32) -> (i32, i32) {
    %c0_i32 = arith.constant 0 : i32
    %c0_i32_0 = arith.constant 0 : i32
    %c0_i32_1 = arith.constant 0 : i32
    return %c0_i32, %c0_i32_0 : i32, i32
  }
  func.func @transform_3(%arg0: i32) -> (i32, i32) {
    %c0_i32 = arith.constant 0 : i32
    %c0_i32_0 = arith.constant 0 : i32
    return %arg0, %c0_i32 : i32, i32
  }
  func.func @transform_4(%arg0: i32) -> (i32, i32) {
    %c0_i32 = arith.constant 0 : i32
    %c0_i32_0 = arith.constant 0 : i32
    return %arg0, %c0_i32 : i32, i32
  }
}

</mosaic_0001>

<bundles_post_ra>
// kernel: tpu_custom_call.1
= control target key start
LH: loop header
LB: loop body
LE: loop exit
PB: predicated region body
PF: predicated region fallthrough
CT: control target
= control target key end

     0   :  { %10 = vsyncpa [#allocation3], 0  ;;  %s1430_s0 = inlined_call_operand.vmem [shape: f32[256,32], index: 0, kind: input, shape index: {}]   ;;  %s1431_s1 = inlined_call_operand.vmem [shape: f32[32,128], index: 1, kind: input, shape index: {}]   ;;  %s1432_s2 = inlined_call_operand.vmem [shape: f32[128,128], index: 2, kind: input, shape index: {}]   ;;  %s1433_s3 = inlined_call_operand.hbm [shape: f32[256,128], index: 3, kind: output, shape index: {0}]   ;;  %s1434_s4 = inlined_call_operand.hbm [shape: f32[256,128], index: 4, kind: output, shape index: {1}]  }
   0x1   :  { %12 = vsyncpa [#allocation3 + $0x1], 0 }
   0x2   :  { %13 = vsyncpa [#allocation5], 0 }
   0x3   :  { %15 = vsyncpa [#allocation5 + $0x1], 0  ;;  %s1148_s15 = smov 0   ;;  %s1150_s16 = smov 0  }
   0x4   :  { %s1152_s17 = smov 0   ;;  %s1154_s18 = smov 0  }
   0x5 LB: > { %s1169_s19 = sadd.s32 4294967295, %s1117_s18   ;;  %s747_s20 = sadd.s32 4294967294, %s1117_s18   ;;  %s1117_s18 = sphi %s1154_s18, %s1440_s18   ;;  %s1113_s17 = sphi %s1152_s17, %s1439_s17   ;;  %s1109_s16 = sphi %s1150_s16, %s1438_s16   ;;  %s1105_s15 = sphi %s1148_s15, %s1437_s15  }
   0x6   : > { %s1173_s21 = sadd.s32 1, %s1117_s18   ;;  %s96_s22 = sadd.s32 1, %s1113_s17 }
   0x7   : > { %s93_s23 = ssub.s32 %s1117_s18, %s1173_s21  ;;  %p106_p0 = scmp.ne.s32.totalorder %s1113_s17, %s1109_s16 }
   0x8   : > { %p94_p1 = scmp.eq.s32.totalorder %s93_s23, 0  ;;  %p107_p2 = scmp.eq.s32.totalorder %s1169_s19, 1 }
   0x9   : > { %p112_p3 = scmp.ne.s32.totalorder %s1109_s16, %s1105_s15  ;;  %p113_p4 = scmp.eq.s32.totalorder %s747_s20, 1 }
   0xa   : > { %s1184_s24 = scalar_select %p94_p1, %s1113_s17, %s96_s22  }
   0xb   : > { %p1186_p5 = por %p107_p2, %p106_p0  ;;  %p1190_p6 = por %p113_p4, %p112_p3 }
   0xc   : > { %p750_p7 = scmp.ge.s32.totalorder %s1117_s18, 1  ;;  %p172_p8 = scmp.lt.s32.totalorder %s1117_s18, 3 }
   0xe   : > { %p173_p9 = pnand %p750_p7, %p172_p8 }
   0xf   : > { %v227_v0 = vld [vmem:[%s1431_s1] sm:$0xff] (!%p173_p9)  ;;  %v228_v1 = vld [vmem:[%s1431_s1 + $0x8] sm:$0xff] (!%p173_p9)  ;;  %v229_v2 = vld [vmem:[%s1431_s1 + $0x10] sm:$0xff] (!%p173_p9)  ;;  %s753_s7 = sshll.u32 (!%p173_p9), %s1169_s19, 4  ;;  %vm231_vm0 = vcmask (!%p173_p9), 261120   ;;  %s1295_s13 = sand.u32 (!%p173_p9), 1, %s1109_s16  }
  0x10   : > { %176 = sbr.rel (%p173_p9) target bundleno = 497 (0x1f1), region = 32  ;;  %v921_v3 = vpack.c.bf16 (!%p173_p9), %v228_v1, %v227_v0  ;;  %v230_v4 = vld [vmem:[%s1431_s1 + $0x18] sm:$0xff] (!%p173_p9)  ;;  %p204_p10 = scmp.lt.s32.totalorder (!%p173_p9), %s753_s7, 31  ;;  %v441_v5 = vld [vmem:[%s1432_s2] sm:$0xff] (!%p173_p9)  ;;  %v442_v6 = vld [vmem:[%s1432_s2 + $0x8] sm:$0xff] (!%p173_p9) }
  0x11   : > { %v925_v7 = vpack.c.bf16 (!%p173_p9), %v230_v4, %v229_v2  ;;  %v929_v8 = vpack.c.bf16 (!%p173_p9), %v442_v6, %v441_v5  ;;  %v443_v9 = vld [vmem:[%s1432_s2 + $0x10] sm:$0xff] (!%p173_p9)  ;;  %v444_v10 = vld [vmem:[%s1432_s2 + $0x18] sm:$0xff] (!%p173_p9)  ;;  %v445_v12 = vld [vmem:[%s1432_s2 + $0x20] sm:$0xff] (!%p173_p9)  ;;  %s751_s14 = sshll.u32 (!%p173_p9), %s1295_s13, 7  ;;  %s619_s29 = scalar_lea.sflag (!%p173_p9), [#allocation3], %s1295_s13 }
  0x12   : > { %922 = vmatprep.subr.bf16.mxu0 (!%p173_p9), %v921_v3  ;;  %v933_v11 = vpack.c.bf16 (!%p173_p9), %v444_v10, %v443_v9  ;;  %v446_v13 = vld [vmem:[%s1432_s2 + $0x28] sm:$0xff] (!%p173_p9)  ;;  %v447_v18 = vld [vmem:[%s1432_s2 + $0x30] sm:$0xff] (!%p173_p9)  ;;  %v448_v19 = vld [vmem:[%s1432_s2 + $0x38] sm:$0xff] (!%p173_p9)  ;;  %s1300_s20 = scalar_lea.vmem (!%p173_p9), [#allocation2], %s751_s14  ;;  %s1119_s5 = smov (!%p173_p9), [#allocation2]  }
  0x13   : > { %924 = vmatpush3.bf16.msra.mxu0 (!%p173_p9), %v921_v3  ;;  %961 = vmatprep.subr.bf16.mxu1 (!%p173_p9), %v929_v8  ;;  %v937_v16 = vpack.c.bf16 (!%p173_p9), %v446_v13, %v445_v12  ;;  %v941_v21 = vpack.c.bf16 (!%p173_p9), %v448_v19, %v447_v18  ;;  %v449_v23 = vld [vmem:[%s1432_s2 + $0x40] sm:$0xff] (!%p173_p9)  ;;  %v450_v24 = vld [vmem:[%s1432_s2 + $0x48] sm:$0xff] (!%p173_p9)  ;;  %v451_v28 = vld [vmem:[%s1432_s2 + $0x50] sm:$0xff] (!%p173_p9)  ;;  %s637_s22 = sshll.u32 (!%p173_p9), %s1300_s20, 4  ;;  %s1027_s6 = sshll.u32 (!%p173_p9), %s1119_s5, 4  ;;  %s1327_s22 = int_to_ptr.vmem [resolvable:$true] %s637_s22  ;;  %s1028_s6 = int_to_ptr.vmem [resolvable:$false] %s1027_s6 }
  0x14   : > { %926 = vmatprep.subr.bf16.mxu0 (!%p173_p9), %v925_v7  ;;  %969 = vmatpush3.bf16.msra.mxu1 (!%p173_p9), %v929_v8  ;;  %v945_v26 = vpack.c.bf16 (!%p173_p9), %v450_v24, %v449_v23  ;;  %v452_v29 = vld [vmem:[%s1432_s2 + $0x58] sm:$0xff] (!%p173_p9)  ;;  %v453_v33 = vld [vmem:[%s1432_s2 + $0x60] sm:$0xff] (!%p173_p9)  ;;  %v454_v34 = vld [vmem:[%s1432_s2 + $0x68] sm:$0xff] (!%p173_p9)  ;;  %s1023_s30 = scalar_lea.vmem (!%p173_p9), %s1327_s22, 2048  ;;  %s1029_s8 = scalar_lea.vmem (!%p173_p9), %s1028_s6, 4096 }
  0x15   : > { %962 = vmatprep.subr.bf16.mxu1 (!%p173_p9), %v933_v11  ;;  %v949_v31 = vpack.c.bf16 (!%p173_p9), %v452_v29, %v451_v28  ;;  %v953_v36 = vpack.c.bf16 (!%p173_p9), %v454_v34, %v453_v33  ;;  %v455_v38 = vld [vmem:[%s1432_s2 + $0x70] sm:$0xff] (!%p173_p9)  ;;  %v456_v39 = vld [vmem:[%s1432_s2 + $0x78] sm:$0xff] (!%p173_p9)  ;;  %p1024_p11 = scmp.ne.s32.totalorder (!%p173_p9), %s1327_s22, %s1023_s30  ;;  %p1030_p0 = scmp.lt.s32.totalorder (!%p173_p9), %s1327_s22, %s1028_s6 }
  0x16   : > { %v957_v41 = vpack.c.bf16 (!%p173_p9), %v456_v39, %v455_v38  ;;  %p1031_p1 = scmp.lt.s32.totalorder (!%p173_p9), %s1029_s8, %s1023_s30 }
  0x17   : > { %s1442_s7 = smov (!%p204_p10, %s753_s7), 31  ;;  %928 = vmatpush3.bf16.msra.mxu0 %v925_v7  ;;  %p1025_p12 = pnand %p1024_p11, %p1186_p5 }
  0x18   : > { %s754_s27 = sshll.u32 %s1442_s7, 3  ;;  %930 = vmatprep.subr.bf16.mxu0 %v929_v8  ;;  %970 = vmatpush3.bf16.msra.mxu1 %v933_v11  ;;  %p1032_p2 = por %p1031_p1, %p1030_p0 }
  0x19   : > { %s1230_s9 = scalar_lea.vmem %s1430_s0, %s754_s27  ;;  %963 = vmatprep.subr.bf16.mxu1 %v937_v16  ;;  %p1026_p13 = pneg %p1025_p12 }
  0x1a   : > { %v211_v14 = vld [vmem:[%s1230_s9] sm:$0xff]  ;;  %v212_v15 = vld [vmem:[%s1230_s9 + $0x8] sm:$0xff]  ;;  %v213_v17 = vld [vmem:[%s1230_s9 + $0x10] sm:$0xff] }
  0x1b   : > { %841 = vmatprep.mubr.msk.f32.mxu0 %vm231_vm0, %v211_v14  ;;  %v214_v20 = vld [vmem:[%s1230_s9 + $0x18] sm:$0xff]  ;;  %v215_v22 = vld [vmem:[%s1230_s9 + $0x20] sm:$0xff]  ;;  %v216_v25 = vld [vmem:[%s1230_s9 + $0x28] sm:$0xff]  ;;  %p1033_p3 = pnand %p1032_p2, %p1026_p13 }
  0x1c   : > { %842 = vmatmul.mubr.msk.f32.vlgmr.msra.gmra.mrb[0].mxu0 %vm231_vm0, %v212_v15  ;;  %971 = vmatpush3.bf16.msra.mxu1 %v937_v16  ;;  %v217_v27 = vld [vmem:[%s1230_s9 + $0x30] sm:$0xff]  ;;  %v218_v30 = vld [vmem:[%s1230_s9 + $0x38] sm:$0xff]  ;;  %v219_v32 = vld [vmem:[%s1230_s9 + $0x40] sm:$0xff] }
  0x1d   : > { %844 = vmatprep.mubr.msk.f32.mxu0 %vm231_vm0, %v213_v17  ;;  %932 = vmatpush3.bf16.msra.mxu0 %v929_v8  ;;  %v220_v35 = vld [vmem:[%s1230_s9 + $0x48] sm:$0xff]  ;;  %v221_v37 = vld [vmem:[%s1230_s9 + $0x50] sm:$0xff]  ;;  %v222_v40 = vld [vmem:[%s1230_s9 + $0x58] sm:$0xff] }
  0x1e   : > { %934 = vmatprep.subr.bf16.mxu0 %v933_v11  ;;  %964 = vmatprep.subr.bf16.mxu1 %v941_v21  ;;  %v223_v42 = vld [vmem:[%s1230_s9 + $0x60] sm:$0xff]  ;;  %v224_v43 = vld [vmem:[%s1230_s9 + $0x68] sm:$0xff]  ;;  %v225_v44 = vld [vmem:[%s1230_s9 + $0x70] sm:$0xff] }
  0x1f   : > { %v226_v45 = vld [vmem:[%s1230_s9 + $0x78] sm:$0xff]  ;;  %s779_s9 = sshll.u32 %s1169_s19, 11 }
  0x20   : > { %845 = vmatmul.mubr.msk.f32.gmra.mrb[2].mxu0 %vm231_vm0, %v214_v20  ;;  %972 = vmatpush3.bf16.msra.mxu1 %v941_v21  ;;  %s1325_s28 = scalar_lea.hbm %s1433_s3, %s779_s9 }
  0x21   : > { %847 = vmatprep.mubr.msk.f32.mxu0 %vm231_vm0, %v215_v22  ;;  %936 = vmatpush3.bf16.msra.mxu0 %v933_v11 }
  0x22   : > { %938 = vmatprep.subr.bf16.mxu0 %v937_v16  ;;  %965 = vmatprep.subr.bf16.mxu1 %v945_v26 }
  0x24   : > { %848 = vmatmul.mubr.msk.f32.gmra.mrb[4].mxu0 %vm231_vm0, %v216_v25  ;;  %973 = vmatpush3.bf16.msra.mxu1 %v945_v26 }
  0x25   : > { %850 = vmatprep.mubr.msk.f32.mxu0 %vm231_vm0, %v217_v27  ;;  %940 = vmatpush3.bf16.msra.mxu0 %v937_v16 }
  0x26   : > { %942 = vmatprep.subr.bf16.mxu0 %v941_v21  ;;  %966 = vmatprep.subr.bf16.mxu1 %v949_v31 }
  0x28   : > { %851 = vmatmul.mubr.msk.f32.gmra.mrb[6].mxu0 %vm231_vm0, %v218_v30  ;;  %974 = vmatpush3.bf16.msra.mxu1 %v949_v31 }
  0x29   : > { %853 = vmatprep.mubr.msk.f32.mxu0 %vm231_vm0, %v219_v32  ;;  %944 = vmatpush3.bf16.msra.mxu0 %v941_v21 }
  0x2a   : > { %946 = vmatprep.subr.bf16.mxu0 %v945_v26  ;;  %967 = vmatprep.subr.bf16.mxu1 %v953_v36 }
  0x2c   : > { %854 = vmatmul.mubr.msk.f32.gmra.mrb[8].mxu0 %vm231_vm0, %v220_v35  ;;  %975 = vmatpush3.bf16.msra.mxu1 %v953_v36 }
  0x2d   : > { %856 = vmatprep.mubr.msk.f32.mxu0 %vm231_vm0, %v221_v37  ;;  %948 = vmatpush3.bf16.msra.mxu0 %v945_v26 }
  0x2e   : > { %950 = vmatprep.subr.bf16.mxu0 %v949_v31  ;;  %968 = vmatprep.subr.bf16.mxu1 %v957_v41 }
  0x30   : > { %857 = vmatmul.mubr.msk.f32.gmra.mrb[10].mxu0 %vm231_vm0, %v222_v40  ;;  %976 = vmatpush3.bf16.msra.mxu1 %v957_v41 }
  0x31   : > { %859 = vmatprep.mubr.msk.f32.mxu0 %vm231_vm0, %v223_v42  ;;  %952 = vmatpush3.bf16.msra.mxu0 %v949_v31 }
  0x32   : > { %954 = vmatprep.subr.bf16.mxu0 %v953_v36 }
  0x34   : > { %860 = vmatmul.mubr.msk.f32.gmra.mrb[12].mxu0 %vm231_vm0, %v224_v43 }
  0x35   : > { %862 = vmatprep.mubr.msk.f32.mxu0 %vm231_vm0, %v225_v44  ;;  %956 = vmatpush3.bf16.msra.mxu0 %v953_v36 }
  0x36   : > { %958 = vmatprep.subr.bf16.mxu0 %v957_v41 }
  0x38   : > { %863 = vmatmul.mubr.msk.f32.gmra.mrb[14].mxu0 %vm231_vm0, %v226_v45 }
  0x39   : > { %960 = vmatpush3.bf16.msra.mxu0 %v957_v41 }
  0xef   : > { %v843_v46 = vpop.f32.mrb[0].mxu0 }
  0xf0   : > { %426 = vst [vmem:[%s1300_s20 + $0x8] sm:$0xff] %v843_v46  ;;  %v346_v47 = vpop.f32.mrb[1].mxu0 }
  0xf1   : > { %425 = vst [vmem:[%s1300_s20] sm:$0xff] %v346_v47  ;;  %897 = vmatprep.mubr.f32.mxu0 %v346_v47 }
  0xf2   : > { %898 = vmatmul.mubr.f32.vlgmr.msra.gmra.mrb[16].mxu0 %v843_v46 }
  0xf3   : > { %v846_v48 = vpop.f32.mrb[2].mxu0 }
  0xf4   : > { %428 = vst [vmem:[%s1300_s20 + $0x18] sm:$0xff] %v846_v48  ;;  %v356_v49 = vpop.f32.mrb[3].mxu0 }
  0xf5   : > { %427 = vst [vmem:[%s1300_s20 + $0x10] sm:$0xff] %v356_v49  ;;  %900 = vmatprep.mubr.f32.mxu0 %v356_v49 }
  0xf6   : > { %901 = vmatmul.mubr.f32.gmra.mrb[18].mxu0 %v846_v48 }
  0xf7   : > { %v849_v50 = vpop.f32.mrb[4].mxu0 }
  0xf8   : > { %430 = vst [vmem:[%s1300_s20 + $0x28] sm:$0xff] %v849_v50  ;;  %v366_v51 = vpop.f32.mrb[5].mxu0 }
  0xf9   : > { %429 = vst [vmem:[%s1300_s20 + $0x20] sm:$0xff] %v366_v51  ;;  %903 = vmatprep.mubr.f32.mxu0 %v366_v51 }
  0xfa   : > { %904 = vmatmul.mubr.f32.gmra.mrb[20].mxu0 %v849_v50 }
  0xfb   : > { %v852_v52 = vpop.f32.mrb[6].mxu0 }
  0xfc   : > { %432 = vst [vmem:[%s1300_s20 + $0x38] sm:$0xff] %v852_v52  ;;  %v376_v53 = vpop.f32.mrb[7].mxu0 }
  0xfd   : > { %431 = vst [vmem:[%s1300_s20 + $0x30] sm:$0xff] %v376_v53  ;;  %906 = vmatprep.mubr.f32.mxu1 %v376_v53 }
  0xfe   : > { %907 = vmatmul.mubr.f32.vlgmr.msra.gmra.mrb[0].mxu1 %v852_v52 }
  0xff   : > { %v855_v54 = vpop.f32.mrb[8].mxu0 }
 0x100   : > { %434 = vst [vmem:[%s1300_s20 + $0x48] sm:$0xff] %v855_v54  ;;  %v386_v55 = vpop.f32.mrb[9].mxu0 }
 0x101   : > { %433 = vst [vmem:[%s1300_s20 + $0x40] sm:$0xff] %v386_v55  ;;  %909 = vmatprep.mubr.f32.mxu1 %v386_v55 }
 0x102   : > { %910 = vmatmul.mubr.f32.gmra.mrb[2].mxu1 %v855_v54 }
 0x103   : > { %v858_v56 = vpop.f32.mrb[10].mxu0 }
 0x104   : > { %436 = vst [vmem:[%s1300_s20 + $0x58] sm:$0xff] %v858_v56  ;;  %v396_v57 = vpop.f32.mrb[11].mxu0 }
 0x105   : > { %435 = vst [vmem:[%s1300_s20 + $0x50] sm:$0xff] %v396_v57  ;;  %912 = vmatprep.mubr.f32.mxu1 %v396_v57 }
 0x106   : > { %913 = vmatmul.mubr.f32.gmra.mrb[4].mxu1 %v858_v56 }
 0x107   : > { %v861_v58 = vpop.f32.mrb[12].mxu0 }
 0x108   : > { %438 = vst [vmem:[%s1300_s20 + $0x68] sm:$0xff] %v861_v58  ;;  %v406_v59 = vpop.f32.mrb[13].mxu0 }
 0x109   : > { %437 = vst [vmem:[%s1300_s20 + $0x60] sm:$0xff] %v406_v59  ;;  %915 = vmatprep.mubr.f32.mxu1 %v406_v59 }
 0x10a   : > { %916 = vmatmul.mubr.f32.gmra.mrb[6].mxu1 %v861_v58 }
 0x10b   : > { %v864_v60 = vpop.f32.mrb[14].mxu0 }
 0x10c   : > { %440 = vst [vmem:[%s1300_s20 + $0x78] sm:$0xff] %v864_v60  ;;  %v416_v61 = vpop.f32.mrb[15].mxu0 }
 0x10d   : > { %439 = vst [vmem:[%s1300_s20 + $0x70] sm:$0xff] %v416_v61  ;;  %918 = vmatprep.mubr.f32.mxu1 %v416_v61 }
 0x10e   : > { %919 = vmatmul.mubr.f32.gmra.mrb[8].mxu1 %v864_v60 }
 0x10f   : > { %1036 = shalt.err (!%p1033_p3)
}
 0x110   : > { %s1037_s7 = scalar_lea.hbm %s1325_s28, 2048  ;;  %s1041_s12 = scalar_lea.hbm %s1433_s3, 4096 }
 0x111   : > { %p1038_p4 = scmp.ne.s32.totalorder %s1325_s28, %s1037_s7  ;;  %p1042_p9 = scmp.lt.u32.totalorder %s1325_s28, %s1433_s3 }
 0x112   : > { %p1043_p10 = scmp.lt.u32.totalorder %s1041_s12, %s1037_s7  ;;  %p1045_p12 = scmp.lt.u32.totalorder %s1037_s7, %s1325_s28 }
 0x113   : > { %p1039_p7 = pnand %p1038_p4, %p1186_p5 }
 0x114   : > { %p1044_p11 = por %p1043_p10, %p1042_p9 }
 0x115   : > { %p1040_p8 = pneg %p1039_p7 }
 0x116   : > { %p1046_p13 = por %p1045_p12, %p1044_p11 }
 0x118   : > { %p1047_p0 = pnand %p1046_p13, %p1040_p8 }
 0x11a   : > { %1050 = shalt.err (!%p1047_p0)
}
 0x11b   : > { %s1120_s27 = smov 128   ;;  %s1121_s30 = smov 8  }
 0x11c   : > { %977 = dma.vmem_to_hbm [thread:$0]  (%p1186_p5), %s1327_s22, 2048, %s1325_s28, %s619_s29, %s1120_s27, %s1120_s27, %s1121_s30  }
 0x11d   : > { %s1358_s5 = scalar_lea.vmem [#allocation4], %s751_s14  ;;  %s1380_s29 = scalar_lea.hbm %s1434_s4, %s779_s9 }
 0x11e   : > { %s653_s14 = sshll.u32 %s1358_s5, 4  ;;  %s624_s6 = scalar_lea.sflag [#allocation5], %s1295_s13  ;;  %s1382_s14 = int_to_ptr.vmem [resolvable:$true] %s653_s14 }
 0x11f   : > { %s1051_s8 = scalar_lea.vmem %s1382_s14, 2048  ;;  %s1122_s19 = smov [#allocation4]  }
 0x120   : > { %p1052_p1 = scmp.ne.s32.totalorder %s1382_s14, %s1051_s8  ;;  %s1055_s7 = sshll.u32 %s1122_s19, 4  ;;  %s1056_s7 = int_to_ptr.vmem [resolvable:$false] %s1055_s7 }
 0x121   : > { %s1057_s10 = scalar_lea.vmem %s1056_s7, 4096  ;;  %p1058_p4 = scmp.lt.s32.totalorder %s1382_s14, %s1056_s7 }
 0x122   : > { %p1053_p2 = pnand %p1052_p1, %p1186_p5  ;;  %p1059_p7 = scmp.lt.s32.totalorder %s1057_s10, %s1051_s8 }
 0x124   : > { %p1054_p3 = pneg %p1053_p2  ;;  %p1060_p8 = por %p1059_p7, %p1058_p4 }
 0x126   : > { %p1061_p9 = pnand %p1060_p8, %p1054_p3 }
 0x1c5   : > { %v899_v62 = vpop.f32.mrb[16].mxu0 }
 0x1c6   : > { %603 = vst [vmem:[%s1358_s5 + $0x8] sm:$0xff] %v899_v62  ;;  %v523_v63 = vpop.f32.mrb[17].mxu0 }
 0x1c7   : > { %602 = vst [vmem:[%s1358_s5] sm:$0xff] %v523_v63 }
 0x1c9   : > { %v902_v0 = vpop.f32.mrb[18].mxu0 }
 0x1ca   : > { %605 = vst [vmem:[%s1358_s5 + $0x18] sm:$0xff] %v902_v0  ;;  %v533_v1 = vpop.f32.mrb[19].mxu0 }
 0x1cb   : > { %604 = vst [vmem:[%s1358_s5 + $0x10] sm:$0xff] %v533_v1 }
 0x1cd   : > { %v905_v2 = vpop.f32.mrb[20].mxu0 }
 0x1ce   : > { %607 = vst [vmem:[%s1358_s5 + $0x28] sm:$0xff] %v905_v2  ;;  %v543_v3 = vpop.f32.mrb[21].mxu0 }
 0x1cf   : > { %606 = vst [vmem:[%s1358_s5 + $0x20] sm:$0xff] %v543_v3 }
 0x1d1   : > { %v908_v4 = vpop.f32.mrb[0].mxu1 }
 0x1d2   : > { %609 = vst [vmem:[%s1358_s5 + $0x38] sm:$0xff] %v908_v4  ;;  %v553_v5 = vpop.f32.mrb[1].mxu1 }
 0x1d3   : > { %608 = vst [vmem:[%s1358_s5 + $0x30] sm:$0xff] %v553_v5 }
 0x1d5   : > { %v911_v6 = vpop.f32.mrb[2].mxu1 }
 0x1d6   : > { %611 = vst [vmem:[%s1358_s5 + $0x48] sm:$0xff] %v911_v6  ;;  %v563_v7 = vpop.f32.mrb[3].mxu1 }
 0x1d7   : > { %610 = vst [vmem:[%s1358_s5 + $0x40] sm:$0xff] %v563_v7 }
 0x1d9   : > { %v914_v8 = vpop.f32.mrb[4].mxu1 }
 0x1da   : > { %613 = vst [vmem:[%s1358_s5 + $0x58] sm:$0xff] %v914_v8  ;;  %v573_v9 = vpop.f32.mrb[5].mxu1 }
 0x1db   : > { %612 = vst [vmem:[%s1358_s5 + $0x50] sm:$0xff] %v573_v9 }
 0x1dd   : > { %v917_v10 = vpop.f32.mrb[6].mxu1 }
 0x1de   : > { %615 = vst [vmem:[%s1358_s5 + $0x68] sm:$0xff] %v917_v10  ;;  %v583_v11 = vpop.f32.mrb[7].mxu1 }
 0x1df   : > { %614 = vst [vmem:[%s1358_s5 + $0x60] sm:$0xff] %v583_v11 }
 0x1e1   : > { %v920_v12 = vpop.f32.mrb[8].mxu1 }
 0x1e2   : > { %617 = vst [vmem:[%s1358_s5 + $0x78] sm:$0xff] %v920_v12  ;;  %v593_v13 = vpop.f32.mrb[9].mxu1 }
 0x1e3   : > { %616 = vst [vmem:[%s1358_s5 + $0x70] sm:$0xff] %v593_v13 }
 0x1e4   : > { %1064 = shalt.err (!%p1061_p9)
}
 0x1e5   : > { %s1065_s9 = scalar_lea.hbm %s1380_s29, 2048  ;;  %s1069_s20 = scalar_lea.hbm %s1434_s4, 4096 }
 0x1e6   : > { %p1066_p10 = scmp.ne.s32.totalorder %s1380_s29, %s1065_s9  ;;  %p1070_p13 = scmp.lt.u32.totalorder %s1380_s29, %s1434_s4 }
 0x1e7   : > { %p1071_p0 = scmp.lt.u32.totalorder %s1069_s20, %s1065_s9  ;;  %p1073_p2 = scmp.lt.u32.totalorder %s1065_s9, %s1380_s29 }
 0x1e8   : > { %p1067_p11 = pnand %p1066_p10, %p1186_p5 }
 0x1e9   : > { %p1072_p1 = por %p1071_p0, %p1070_p13 }
 0x1ea   : > { %p1068_p12 = pneg %p1067_p11 }
 0x1eb   : > { %p1074_p3 = por %p1073_p2, %p1072_p1 }
 0x1ed   : > { %p1075_p4 = pnand %p1074_p3, %p1068_p12 }
 0x1ef   : > { %1078 = shalt.err (!%p1075_p4)
}
 0x1f0   : > { %978 = dma.vmem_to_hbm [thread:$0]  (%p1186_p5), %s1382_s14, 2048, %s1380_s29, %s624_s6, %s1120_s27, %s1120_s27, %s1121_s30  }
 0x1f1 PF: > { %p988_p7 = scmp.ge.s32.totalorder %s1117_s18, 2  ;;  %s668_s22 = sand.u32 1, %s1105_s15  }
 0x1f2   : > { %s669_s28 = scalar_lea.sflag [#allocation3], %s668_s22 }
 0x1f3   : > { %p982_p8 = pnand %p988_p7, %p1190_p6 }
 0x1f5   : > { %1096 = dma.done.wait (!%p982_p8), %s669_s28, 2048  }
 0x1f6   : > { %1098 = vsyncadd (!%p982_p8), %s669_s28, 4294965248  ;;  %s678_s25 = scalar_lea.sflag [#allocation5], %s668_s22 }
 0x1f7   : > { %1100 = dma.done.wait (!%p982_p8), %s678_s25, 2048  }
 0x1f8   : > { %1102 = vsyncadd (!%p982_p8), %s678_s25, 4294965248  ;;  %p18_p5 = scmp.ge.s32.totalorder %s1173_s21, 4   ;;  %s1437_s15 = smov %s1109_s16 }
 0x1f9   : > { %s1438_s16 = smov %s1113_s17  ;;  %s1439_s17 = smov %s1184_s24 }
 0x1fa   : > { %s1440_s18 = smov %s1173_s21  ;;  %20 = sbr.rel (!%p18_p5) target bundleno = 5 (0x5), region = 84 }
 0x201   :  { %683 = vsyncpa [#allocation3], 1 }
 0x202   :  { %685 = vsyncpa [#allocation3 + $0x1], 1 }
 0x203   :  { %686 = vsyncpa [#allocation5], 1 }
 0x204   :  { %688 = vsyncpa [#allocation5 + $0x1], 1 }

</bundles_post_ra>
